<compile_context>
chip_gen: v7x
topology: tpu7x:2x2x1
jax: 0.10.0
libtpu: 0.0.40
codegen_flags: <defaults>
</compile_context>

<pallas_src>
import math
import functools

import jax
import jax.numpy as jnp
from jax.experimental import pallas as pl
from jax.experimental.pallas import tpu as pltpu


def make_positional_encoding(pe_dim: int, max_len: int) -> jnp.ndarray:
    """Replicates PositionalEncoding.__init__'s `pe` buffer; returns (max_len, pe_dim) f32."""
    position = jnp.arange(max_len, dtype=jnp.float32)[:, None]                  # (max_len, 1)
    div_term = jnp.exp(
        jnp.arange(0, pe_dim, 2, dtype=jnp.float32) * (-math.log(pe_dim) / pe_dim)
    )                                                                           # (ceil(pe_dim/2),)
    angles = position * div_term                                                # (max_len, ceil(pe_dim/2))
    pe = jnp.zeros((max_len, pe_dim), jnp.float32)
    pe = pe.at[:, 0::2].set(jnp.sin(angles))
    pe = pe.at[:, 1::2].set(jnp.cos(angles[:, : pe_dim // 2]))                  # safe for odd pe_dim
    return pe


def _pe_concat_kernel(x_ref, pe_ref, out_ref, *, d_x: int, tile_l: int):
    # x_ref  : (Bb, tile_l, D_x)        x.dtype
    # pe_ref : (L_pad, pe_dim)          x.dtype   (whole array, VMEM-resident, one DMA total)
    # out_ref: (Bb, tile_l, D_x+pe_dim) x.dtype
    l = pl.program_id(1)
    start = pl.multiple_of(l * tile_l, tile_l)
    pe_tile = pe_ref[pl.ds(start, tile_l), :]                    # (tile_l, pe_dim)

    bb = out_ref.shape[0]
    pe_dim = pe_tile.shape[-1]

    # Two static-slice sub-stores into the output block (no concatenate, no full-slab vreg
    # materialization).  x half is lane-offset 0; pe half is lane-offset D_x.
    out_ref[:, :, :d_x] = x_ref[...]
    out_ref[:, :, d_x:] = jnp.broadcast_to(pe_tile[None, :, :], (bb, tile_l, pe_dim))


def _choose_tiles(B: int, L: int, D_x: int, D_out: int, pe_dim: int, itemsize: int):
    """Pick (Bb, tile_l) from a byte budget: multi-MiB output per grid step, while
    2x(double-buffered x + out blocks) + the fully-resident pe stay under ~40 MiB
    (safe on v7x's 64 MiB physical VMEM as well as v5e/v6e)."""
    sub = 16 if itemsize == 2 else (32 if itemsize == 1 else 8)   # sublane multiple per dtype
    VMEM_BUDGET = 40 * 1024 * 1024
    TARGET = 4 * 1024 * 1024                                      # ~4 MiB of output per step
    pe_bytes = 2 * (L + 1024) * pe_dim * itemsize                 # conservative (incl. padding)

    def vmem_need(bb, tl):
        x_blk = bb * tl * D_x * itemsize
        o_blk = bb * tl * D_out * itemsize
        return 2 * (x_blk + o_blk) + pe_bytes

    # Sequence tile: prefer divisors of L that are sublane multiples (no boundary blocks);
    # otherwise any sublane multiple (boundary handled by the cdiv grid + padded pe).
    if L <= sub:
        tile_l = L
    else:
        divisors = [t for t in range(sub, L + 1, sub) if L % t == 0]
        cands = divisors if divisors else list(range(sub, L + 1, sub))
        tile_l = cands[0]
        for t in cands:
            if vmem_need(1, t) <= VMEM_BUDGET and t * D_out * itemsize <= TARGET:
                tile_l = t

    # Batch block: divisor of B, capped at B//2 so the outer (megacore) axis keeps >=2 steps.
    bb_cap = max(1, B // 2)
    bb = 1
    for b in range(1, bb_cap + 1):
        if (B % b == 0 and vmem_need(b, tile_l) <= VMEM_BUDGET
                and b * tile_l * D_out * itemsize <= 2 * TARGET):
            bb = b
    return bb, tile_l


def positional_encoding_forward(x: jnp.ndarray, pe: jnp.ndarray) -> jnp.ndarray:
    """out = concat([x, pe broadcast over batch], axis=-1). Requires x.shape[1] == pe.shape[0]."""
    B, L, D_x = x.shape
    max_len, pe_dim = pe.shape
    assert L == max_len, "PositionalEncoding.forward requires x.size(1) == max_len"
    D_out = D_x + pe_dim
    dtype = x.dtype
    itemsize = jnp.dtype(dtype).itemsize

    # Cast pe to the compute dtype ONCE, outside the kernel (no per-step casts, no f32 upcast of x).
    pe = pe.astype(dtype)

    Bb, tile_l = _choose_tiles(B, L, D_x, D_out, pe_dim, itemsize)
    n_b = pl.cdiv(B, Bb)          # Bb divides B by construction
    n_l = pl.cdiv(L, tile_l)

    # Pad pe (tiny) so the in-kernel pl.ds slice never reads past its VMEM allocation
    # when tile_l does not divide L.  x/out boundary blocks are masked by Pallas.
    L_pad = n_l * tile_l
    if L_pad != L:
        pe = jnp.pad(pe, ((0, L_pad - L), (0, 0)))

    # VMEM: actual need + margin, never above 48 MiB (safe on v7x; ample for this copy kernel).
    vmem_need = 2 * (Bb * tile_l * D_x + Bb * tile_l * D_out + L_pad * pe_dim) * itemsize
    vmem_limit = int(min(48 * 1024 * 1024, max(vmem_need + (4 << 20), 16 << 20)))

    kernel = functools.partial(_pe_concat_kernel, d_x=D_x, tile_l=tile_l)

    return pl.pallas_call(
        kernel,
        out_shape=jax.ShapeDtypeStruct((B, L, D_out), dtype),
        # Batch outermost (>=2 steps whenever B>=2, so both v7x TensorCores stream);
        # seq innermost gives contiguous HBM output writes.  pe's constant block index
        # means it is DMA'd exactly once and stays VMEM-resident for the whole grid.
        grid=(n_b, n_l),
        in_specs=[
            pl.BlockSpec((Bb, tile_l, D_x), lambda b, l: (b, l, 0)),
            pl.BlockSpec((L_pad, pe_dim), lambda b, l: (0, 0)),
        ],
        out_specs=pl.BlockSpec((Bb, tile_l, D_out), lambda b, l: (b, l, 0)),
        compiler_params=pltpu.CompilerParams(
            dimension_semantics=("parallel", "parallel"),
            vmem_limit_bytes=vmem_limit,
        ),
    )(x, pe)


if __name__ == "__main__":
    key = jax.random.PRNGKey(0)

    # Small shapes consistent with the module: batch=2, seq(max_len)=8, hidden=32, pe_dim=32.
    B, L, D_x, pe_dim = 2, 8, 32, 32

    x = jax.random.normal(key, (B, L, D_x), dtype=jnp.float32)
    pe = make_positional_encoding(pe_dim, L)

    # f32 path
    out = jax.block_until_ready(positional_encoding_forward(x, pe))
    ref = jnp.concatenate([x, jnp.broadcast_to(pe[None], (B, L, pe_dim))], axis=-1)
    assert out.shape == (B, L, D_x + pe_dim), f"bad shape {out.shape}"
    assert out.dtype == x.dtype, f"bad dtype {out.dtype}"
    assert jnp.array_equal(out, ref), "positional-encoding concat mismatch (f32)"

    # bf16 path (native-dtype I/O, no upcast inside the kernel)
    xb = x.astype(jnp.bfloat16)
    outb = jax.block_until_ready(positional_encoding_forward(xb, pe))
    refb = jnp.concatenate(
        [xb, jnp.broadcast_to(pe[None].astype(jnp.bfloat16), (B, L, pe_dim))], axis=-1
    )
    assert outb.dtype == jnp.bfloat16, f"bad dtype {outb.dtype}"
    assert jnp.array_equal(outb, refb), "positional-encoding concat mismatch (bf16)"

    print("KERNEL_OK")
</pallas_src>

<mosaic_0001>
module attributes {stable_mosaic.version = 11 : i64} {
  func.func @_pe_concat_kernel(%arg0: i32, %arg1: i32, %arg2: memref<1x8x32xf32, #tpu.memory_space<vmem>>, %arg3: memref<8x32xf32, #tpu.memory_space<vmem>>, %arg4: memref<1x8x64xf32, #tpu.memory_space<vmem>>) attributes {dimension_semantics = [#tpu.dimension_semantics<parallel>, #tpu.dimension_semantics<parallel>], iteration_bounds = array<i64: 2, 1>, scalar_prefetch = 0 : i64, scratch_operands = 0 : i64, tpu.core_type = #tpu.core_type<tc>, window_params = [{transform_indices = @transform_0, window_bounds = array<i64: 1, 8, 32>}, {pipeline_mode = #tpu.pipeline_mode<synchronous>, transform_indices = @transform_1, window_bounds = array<i64: 8, 32>}, {transform_indices = @transform_2, window_bounds = array<i64: 1, 8, 64>}]} {
    %c8_i32 = arith.constant 8 : i32
    %0 = arith.muli %arg1, %c8_i32 : i32
    %1 = tpu.assume_multiple %0, 8 : i32
    %2 = arith.index_cast %1 : i32 to index
    %c0 = arith.constant 0 : index
    %3 = vector.load %arg3[%2, %c0] : memref<8x32xf32, #tpu.memory_space<vmem>>, vector<8x32xf32>
    %c0_0 = arith.constant 0 : index
    %c0_1 = arith.constant 0 : index
    %c0_2 = arith.constant 0 : index
    %4 = vector.load %arg2[%c0_0, %c0_1, %c0_2] : memref<1x8x32xf32, #tpu.memory_space<vmem>>, vector<1x8x32xf32>
    %c0_3 = arith.constant 0 : index
    %c0_4 = arith.constant 0 : index
    %c0_5 = arith.constant 0 : index
    %5 = vector.load %arg4[%c0_3, %c0_4, %c0_5] : memref<1x8x64xf32, #tpu.memory_space<vmem>>, vector<1x8x32xf32>
    tpu.vector_store %arg4[%c0_3, %c0_4, %c0_5], %4 {strides = array<i32>} : memref<1x8x64xf32, #tpu.memory_space<vmem>>, vector<1x8x32xf32>,
    %6 = vector.shape_cast %3 : vector<8x32xf32> to vector<1x8x32xf32>
    %c0_6 = arith.constant 0 : index
    %c0_7 = arith.constant 0 : index
    %c32 = arith.constant 32 : index
    %7 = vector.load %arg4[%c0_6, %c0_7, %c32] : memref<1x8x64xf32, #tpu.memory_space<vmem>>, vector<1x8x32xf32>
    tpu.vector_store %arg4[%c0_6, %c0_7, %c32], %6 {strides = array<i32>} : memref<1x8x64xf32, #tpu.memory_space<vmem>>, vector<1x8x32xf32>,
    return
  }
  func.func @transform_0(%arg0: i32, %arg1: i32) -> (i32, i32, i32) {
    %c0_i32 = arith.constant 0 : i32
    %c0_i32_0 = arith.constant 0 : i32
    return %arg0, %arg1, %c0_i32 : i32, i32, i32
  }
  func.func @transform_1(%arg0: i32, %arg1: i32) -> (i32, i32) {
    %c0_i32 = arith.constant 0 : i32
    %c0_i32_0 = arith.constant 0 : i32
    %c0_i32_1 = arith.constant 0 : i32
    return %c0_i32, %c0_i32_0 : i32, i32
  }
  func.func @transform_2(%arg0: i32, %arg1: i32) -> (i32, i32, i32) {
    %c0_i32 = arith.constant 0 : i32
    %c0_i32_0 = arith.constant 0 : i32
    return %arg0, %arg1, %c0_i32 : i32, i32, i32
  }
}

</mosaic_0001>

<bundles_post_ra>
// kernel: tpu_custom_call.1
= control target key start
LH: loop header
LB: loop body
LE: loop exit
PB: predicated region body
PF: predicated region fallthrough
CT: control target
= control target key end

     0   :  { %7 = vsyncpa [#allocation3], 0  ;;  %s778_s0 = inlined_call_operand.hbm [shape: f32[2,8,32], index: 0, kind: input, shape index: {}]   ;;  %s779_s1 = inlined_call_operand.hbm [shape: f32[8,32], index: 1, kind: input, shape index: {}]   ;;  %s780_s2 = inlined_call_operand.hbm [shape: f32[2,8,64], index: 2, kind: output, shape index: {}]  }
   0x1   :  { %9 = vsyncpa [#allocation3 + $0x1], 0 }
   0x2   :  { %10 = vsyncpa [#allocation6], 0 }
   0x3   :  { %11 = vsyncpa [#allocation4], 0 }
   0x4   :  { %13 = vsyncpa [#allocation4 + $0x1], 0  ;;  %s562_s9 = smov 0   ;;  %s564_s10 = smov 0  }
   0x5   :  { %s566_s11 = smov 0   ;;  %s568_s12 = smov 0  }
   0x6   :  { %s570_s13 = smov 0   ;;  %s572_s14 = smov 0  }
   0x7 LB: > { %s308_s15 = sadd.s32 4294967295, %s541_s14   ;;  %s309_s16 = sadd.s32 4294967294, %s541_s14   ;;  %s541_s14 = sphi %s572_s14, %s19_s14   ;;  %s537_s13 = sphi %s570_s13, %s805_s13   ;;  %s533_s12 = sphi %s568_s12, %s804_s12   ;;  %s529_s11 = sphi %s566_s11, %s803_s11   ;;  %s525_s10 = sphi %s564_s10, %s802_s10   ;;  %s521_s9 = sphi %s562_s9, %s801_s9  }
   0x8   : > { %p53_p0 = scmp.ne.s32.totalorder %s525_s10, %s521_s9  ;;  %p596_p1 = scmp.eq.s32.totalorder %s308_s15, 0 }
   0x9   : > { %p600_p2 = scmp.eq.s32.totalorder %s308_s15, 1  ;;  %p106_p3 = scmp.eq.s32.totalorder %s309_s16, 1 }
   0xa   : > { %s785_s17 = scalar_select %p596_p1, 1, 0 }
   0xb   : > { %s786_s18 = scalar_select %p600_p2, 1, 0 }
   0xc   : > { %p606_p4 = por %p596_p1, %p53_p0  ;;  %p310_p5 = scmp.ge.s32.totalorder %s541_s14, 1 }
   0xd   : > { %p611_p6 = por %p106_p3, %p53_p0  ;;  %p113_p7 = scmp.lt.s32.totalorder %s541_s14, 3 }
   0xe   : > { %s787_s19 = scalar_select %p606_p4, 1, 0 }
   0xf   : > { %s788_s20 = scalar_select %p611_p6, 1, 0 }
  0x10   : > { %p616_p8 = pnand %p310_p5, %p113_p7  ;;  %s543_s22 = smov [#allocation5]  }
  0x11   : > { %s126_s23 = sshll.u32 %s543_s22, 4  ;;  %s31_s25 = sadd.s32 1, %s537_s13  ;;  %s127_s23 = int_to_ptr.vmem [resolvable:$true] %s126_s23 }
  0x12   : > { %s789_s21 = scalar_select %p616_p8, 1, 0 }
  0x13   : > { %p331_p10 = pneg %p616_p8  ;;  %s40_s26 = sadd.s32 1, %s529_s11 }
  0x14   : > { %p631_p12 = scmp.ge.s32.totalorder %s31_s25, 2  ;;  %s397_s30 = scalar_lea.hbm %s779_s1, 128 }
  0x15   : > { %p625_p11 = pnand %p331_p10, %p596_p1  ;;  %p398_p13 = scmp.ne.s32.totalorder %s779_s1, %s397_s30 }
  0x16   : > { %s791_s27 = scalar_select %p631_p12, 1, 0 }
  0x17   : > { %p399_p0 = pneg %p625_p11  ;;  %p404_p7 = scmp.lt.u32.totalorder %s397_s30, %s779_s1 }
  0x19   : > { %p400_p3 = pnand %p399_p0, %p398_p13 }
  0x1b   : > { %p401_p5 = pneg %p400_p3 }
  0x1d   : > { %p406_p10 = pnand %p404_p7, %p401_p5 }
  0x1f   : > { %409 = shalt.err (!%p406_p10)
}
  0x20   : > { %s410_s7 = scalar_lea.vmem %s127_s23, 128  ;;  %p418_p4 = scmp.lt.s32.totalorder %s127_s23, %s127_s23 }
  0x21   : > { %p411_p9 = scmp.ne.s32.totalorder %s127_s23, %s410_s7  ;;  %p419_p8 = scmp.lt.s32.totalorder %s410_s7, %s410_s7 }
  0x23   : > { %p413_p6 = pnand %p411_p9, %p399_p0  ;;  %p420_p2 = por %p419_p8, %p418_p4 }
  0x25   : > { %p414_p1 = pneg %p413_p6 }
  0x27   : > { %p421_p12 = pnand %p420_p2, %p414_p1 }
  0x29   : > { %424 = shalt.err (!%p421_p12)
}
  0x2a   : > { %334 = dma.hbm_to_vmem [thread:$0]  (!%p625_p11), %s779_s1, 128, %s127_s23, [#allocation6]  }
  0x2b   : > { %p792_p4 = scmp.ne.s32.totalorder %s791_s27, 0  ;;  %p47_p1 = scmp.ne.s32.totalorder %s529_s11, %s525_s10 }
  0x2c   : > { %p48_p2 = scmp.eq.s32.totalorder %s541_s14, 0  ;;  %p344_p6 = scmp.lt.s32.totalorder %s541_s14, 2 }
  0x2d   : > { %s807_s25 = smov (%p792_p4, %s31_s25), 0  ;;  %p793_p12 = scmp.ne.s32.totalorder %s786_s18, 0 }
  0x2e   : > { %s35_s16 = ssub.s32 %s537_s13, %s807_s25  ;;  %p49_p9 = por %p48_p2, %p47_p1 }
  0x2f   : > { %p38_p8 = scmp.eq.s32.totalorder %s35_s16, 0  ;;  %p663_p13 = por %p793_p12, %p47_p1 }
  0x30   : > { %s137_s24 = sand.u32 1, %s529_s11   ;;  %s314_s27 = sshll.u32 %s537_s13, 7 }
  0x31   : > { %s671_s28 = scalar_select %p38_p8, %s529_s11, %s40_s26  }
  0x32   : > { %s313_s23 = sshll.u32 %s137_s24, 3  ;;  %s677_s3 = scalar_lea.hbm %s778_s0, %s314_s27 }
  0x33   : > { %s141_s18 = scalar_lea.vmem [#allocation2], %s313_s23  ;;  %p681_p11 = pnand %p344_p6, %p49_p9 }
  0x34   : > { %s149_s4 = sshll.u32 %s141_s18, 4  ;;  %s138_s26 = scalar_lea.sflag [#allocation3], %s137_s24  ;;  %s679_s4 = int_to_ptr.vmem [resolvable:$true] %s149_s4 }
  0x35   : > { %s425_s6 = scalar_lea.hbm %s677_s3, 128  ;;  %p427_p3 = pneg %p681_p11 }
  0x36   : > { %p426_p0 = scmp.ne.s32.totalorder %s677_s3, %s425_s6  ;;  %s430_s15 = scalar_lea.hbm %s778_s0, 256 }
  0x37   : > { %p431_p10 = scmp.lt.u32.totalorder %s677_s3, %s778_s0  ;;  %p432_p4 = scmp.lt.u32.totalorder %s430_s15, %s425_s6 }
  0x38   : > { %p428_p5 = pnand %p427_p3, %p426_p0  ;;  %p434_p2 = scmp.lt.u32.totalorder %s425_s6, %s677_s3 }
  0x39   : > { %p433_p1 = por %p432_p4, %p431_p10 }
  0x3a   : > { %p429_p7 = pneg %p428_p5 }
  0x3b   : > { %p435_p6 = por %p434_p2, %p433_p1 }
  0x3d   : > { %p436_p8 = pnand %p435_p6, %p429_p7 }
  0x3f   : > { %439 = shalt.err (!%p436_p8)
}
  0x40   : > { %s440_s24 = scalar_lea.vmem %s679_s4, 128  ;;  %s544_s27 = smov [#allocation2]  }
  0x41   : > { %p441_p9 = scmp.ne.s32.totalorder %s679_s4, %s440_s24  ;;  %s445_s29 = sshll.u32 %s544_s27, 4  ;;  %s446_s29 = int_to_ptr.vmem [resolvable:$false] %s445_s29 }
  0x42   : > { %s447_s30 = scalar_lea.vmem %s446_s29, 256  ;;  %p448_p5 = scmp.lt.s32.totalorder %s679_s4, %s446_s29 }
  0x43   : > { %p443_p12 = pnand %p441_p9, %p427_p3  ;;  %p449_p10 = scmp.lt.s32.totalorder %s447_s30, %s440_s24 }
  0x45   : > { %p444_p0 = pneg %p443_p12  ;;  %p450_p4 = por %p449_p10, %p448_p5 }
  0x47   : > { %p451_p1 = pnand %p450_p4, %p444_p0 }
  0x49   : > { %454 = shalt.err (!%p451_p1)
}
  0x4a   : > { %338 = dma.hbm_to_vmem [thread:$0]  (!%p681_p11), %s677_s3, 128, %s679_s4, %s138_s26  }
  0x4b   : > { %p796_p7 = scmp.ne.s32.totalorder %s789_s21, 0 }
  0x4c   : > { %s713_s18 = sand.u32 (!%p796_p7), 1, %s525_s10   ;;  %p797_p3 = scmp.ne.s32.totalorder (!%p796_p7), %s787_s19, 0 }
  0x4d   : > { %158 = sbr.rel (%p796_p7) target bundleno = 219 (0xdb), region = 28  ;;  %s316_s6 = sshll.u32 (!%p796_p7), %s713_s18, 3 }
  0x4e   : > { %s161_s7 = scalar_lea.sflag (!%p796_p7), [#allocation3], %s713_s18  ;;  %s164_s8 = scalar_lea.vmem (!%p796_p7), [#allocation2], %s316_s6 }
  0x54   : > { %508 = dma.done.wait (%p797_p3), %s161_s7, 128  }
  0x55   : > { %510 = vsyncadd (%p797_p3), %s161_s7, 4294967168  ;;  %p798_p2 = scmp.ne.s32.totalorder %s785_s17, 0 }
  0x57   : > { %512 = dma.done.wait (%p798_p2), [#allocation6], 128  }
  0x58   : > { %514 = vsyncadd (%p798_p2), [#allocation6], 4294967168  ;;  %vm193_vm0 = vcmask 261120   ;;  %v192_v0 = vld [vmem:[%s164_s8] sm:$0xff]  ;;  %v191_v1 = vld [vmem:[#allocation5] sm:$0xff]  ;;  %s188_s21 = scalar_lea.vmem [#allocation7], %s316_s6 }
  0x59   : > { %194 = vst.msk [vmem:[%s188_s21] sm:$0xff] %vm193_vm0, %v192_v0  ;;  %s545_s3 = smov 32   ;;  %s320_s4 = sshll.u32 %s533_s12, 7  ;;  %vm199_vm1 = vcmask 523520  }
  0x5a   : > { %196 = vrot.lane.b32.xlu0 %v191_v1, %s545_s3  ;;  %s216_s5 = sshll.u32 %s188_s21, 4  ;;  %s729_s15 = scalar_lea.hbm %s780_s2, %s320_s4  ;;  %s731_s5 = int_to_ptr.vmem [resolvable:$true] %s216_s5 }
  0x5b   : > { %s202_s17 = scalar_lea.sflag [#allocation4], %s713_s18  ;;  %s455_s16 = scalar_lea.vmem %s731_s5, 128 }
  0x5c   : > { %p456_p11 = scmp.ne.s32.totalorder %s731_s5, %s455_s16  ;;  %s546_s12 = smov [#allocation7]  }
  0x5d   : > { %s459_s23 = sshll.u32 %s546_s12, 4  ;;  %s460_s23 = int_to_ptr.vmem [resolvable:$false] %s459_s23 }
  0x5e   : > { %p457_p6 = pnand %p456_p11, %p663_p13  ;;  %s461_s24 = scalar_lea.vmem %s460_s23, 256 }
  0x5f   : > { %p462_p9 = scmp.lt.s32.totalorder %s731_s5, %s460_s23  ;;  %p463_p12 = scmp.lt.s32.totalorder %s461_s24, %s455_s16 }
  0x60   : > { %p458_p8 = pneg %p457_p6 }
  0x61   : > { %p464_p0 = por %p463_p12, %p462_p9 }
  0x63   : > { %p465_p5 = pnand %p464_p0, %p458_p8 }
  0xcc   : > { %v197_v2 = vpop.permute.xlu0 %196 }
  0xcd   : > { %200 = vst.msk [vmem:[%s188_s21] sm:$0xff] %vm199_vm1, %v197_v2 }
  0xce   : > { %468 = shalt.err (!%p465_p5)
}
  0xcf   : > { %s469_s27 = scalar_lea.hbm %s729_s15, 128  ;;  %s473_s18 = scalar_lea.hbm %s780_s2, 256 }
  0xd0   : > { %p470_p10 = scmp.ne.s32.totalorder %s729_s15, %s469_s27  ;;  %p474_p7 = scmp.lt.u32.totalorder %s729_s15, %s780_s2 }
  0xd1   : > { %p475_p3 = scmp.lt.u32.totalorder %s473_s18, %s469_s27  ;;  %p477_p11 = scmp.lt.u32.totalorder %s469_s27, %s729_s15 }
  0xd2   : > { %p471_p4 = pnand %p470_p10, %p663_p13 }
  0xd3   : > { %p476_p2 = por %p475_p3, %p474_p7 }
  0xd4   : > { %p472_p1 = pneg %p471_p4 }
  0xd5   : > { %p478_p6 = por %p477_p11, %p476_p2 }
  0xd7   : > { %p479_p8 = pnand %p478_p6, %p472_p1 }
  0xd9   : > { %482 = shalt.err (!%p479_p8)
}
  0xda   : > { %329 = dma.vmem_to_hbm [thread:$0]  (%p663_p13), %s731_s5, 128, %s729_s15, %s202_s17  }
  0xdb PF: > { %s228_s8 = sand.u32 1, %s521_s9   ;;  %p799_p9 = scmp.ne.s32.totalorder %s788_s20, 0 }
  0xdc   : > { %p800_p12 = scmp.ge.s32.totalorder %s541_s14, 2  ;;  %s229_s21 = scalar_lea.sflag [#allocation4], %s228_s8 }
  0xde   : > { %p340_p0 = pnand %p800_p12, %p799_p9 }
  0xe0   : > { %516 = dma.done.wait (!%p340_p0), %s229_s21, 128  }
  0xe1   : > { %518 = vsyncadd (!%p340_p0), %s229_s21, 4294967168  ;;  %s19_s14 = sadd.s32 1, %s541_s14   ;;  %s801_s9 = smov %s525_s10 }
  0xe2   : > { %p16_p5 = scmp.ge.s32.totalorder %s19_s14, 4   ;;  %s802_s10 = smov %s529_s11 }
  0xe3   : > { %s803_s11 = smov %s671_s28  ;;  %s804_s12 = smov %s537_s13 }
  0xe4   : > { %s805_s13 = smov %s807_s25  ;;  %18 = sbr.rel (!%p16_p5) target bundleno = 7 (0x7), region = 78 }
  0xeb   :  { %234 = vsyncpa [#allocation3], 1 }
  0xec   :  { %236 = vsyncpa [#allocation3 + $0x1], 1 }
  0xed   :  { %237 = vsyncpa [#allocation6], 1 }
  0xee   :  { %238 = vsyncpa [#allocation4], 1 }
  0xef   :  { %240 = vsyncpa [#allocation4 + $0x1], 1 }

</bundles_post_ra>
